<compile_context>
chip_gen: v7x
topology: tpu7x:2x2x1
jax: 0.10.0
libtpu: 0.0.40
codegen_flags: <defaults>
</compile_context>

<pallas_src>
import functools

import jax
import jax.numpy as jnp
from jax.experimental import pallas as pl
from jax.experimental.pallas import tpu as pltpu

BN_EPS = 1e-5
_TARGET_STEP_BYTES = 2 * 1024 * 1024  # aim for ~2 MiB of DMA per grid step


def _vmem_limit_bytes():
    """Generation-aware scoped-VMEM limit (128 MiB on v5e/v6e, 64 MiB on v7x)."""
    try:
        cap = int(pltpu.get_tpu_info().vmem_capacity_bytes)
    except Exception:  # pragma: no cover - info unavailable at trace time
        cap = 64 * 1024 * 1024
    # 3/4 of physical, capped: ~96 MiB on 128-MiB chips, ~48 MiB on v7x.
    return max(16 * 1024 * 1024, min(cap * 3 // 4, 100 * 1024 * 1024))


def _largest_divisor_leq(n, cap):
    cap = max(1, min(cap, n))
    for d in range(cap, 0, -1):
        if n % d == 0:
            return d
    return 1


def _choose_blocking(n, hw, per_lane_img_bytes, vmem_budget):
    """Pick (NB images per step, TM spatial lanes per step) from a DMA-bytes
    target and the VMEM budget.  TM is a multiple of 128 (or the full HW)."""
    img_bytes = per_lane_img_bytes * hw
    nb_target = max(1, _TARGET_STEP_BYTES // max(img_bytes, 1))
    nb = _largest_divisor_leq(n, min(nb_target, 8))
    per_lane = nb * per_lane_img_bytes
    tm_cap = (vmem_budget // 2) // max(per_lane, 1)      # double-buffered tiles
    tm = min(tm_cap, max(128, _TARGET_STEP_BYTES // max(per_lane, 1)))
    tm = max(128, (tm // 128) * 128)                     # lane aligned
    if tm >= hw:
        tm = hw                                          # full spatial axis
    return nb, tm


def _conv1x1(w, x):
    """(Cout, Cin) @ (Cin, TM) -> (Cout, TM), f32.

    For Cin < 8 the MXU contraction would be padded ~32x and the op is
    HBM-bound anyway, so broadcast-FMAs on the VPU over the lane-dense
    spatial axis are used; larger Cin goes to the MXU (vmatmul issues on the
    vector-extended slot, leaving the VALU free)."""
    cin = w.shape[1]
    if cin < 8:
        y = w[:, 0:1] * x[0:1, :]
        for k in range(1, cin):
            y = y + w[:, k:k + 1] * x[k:k + 1, :]
        return y
    return jnp.dot(w, x, preferred_element_type=jnp.float32)


def _stats_kernel(x_ref, sumx_ref, gram_ref, *, hw, m_per):
    """Accumulate sum(x) and x@x^T over the spatial ('arbitrary') grid axis."""
    nb, cin, tm = x_ref.shape

    @pl.when(pl.program_id(2) == 0)
    def _():
        sumx_ref[...] = jnp.zeros_like(sumx_ref)
        gram_ref[...] = jnp.zeros_like(gram_ref)

    need_mask = (hw % tm) != 0
    if need_mask:
        # Global block index along the spatial axis (chunk * m_per + mm).
        g_blk = pl.program_id(0) * m_per + pl.program_id(2)
        col = jax.lax.broadcasted_iota(jnp.int32, (cin, tm), 1)
        valid = (g_blk * tm + col) < hw

    sx = jnp.zeros((cin, 1), jnp.float32)
    gm = jnp.zeros((cin, cin), jnp.float32)
    for b in range(nb):
        xb = x_ref[b].astype(jnp.float32)                 # (Cin, TM)
        if need_mask:
            xb = jnp.where(valid, xb, 0.0)
        sx = sx + jnp.sum(xb, axis=1, keepdims=True)
        # Gram: contraction over the big, lane-aligned TM axis (MXU).
        gm = gm + jax.lax.dot_general(
            xb, xb, (((1,), (1,)), ((), ())),
            preferred_element_type=jnp.float32)
    sumx_ref[...] += sx
    gram_ref[...] += gm


def _norm_kernel(w_ref, scale_ref, shift_ref, x_ref, o_ref):
    """Per tile: 1x1 conv recompute + fused BN scale/shift + ReLU."""
    w = w_ref[...]                                        # (Cout, Cin) f32
    scale = scale_ref[...]                                # (Cout, 1)
    shift = shift_ref[...]                                # (Cout, 1)
    nb = x_ref.shape[0]
    for b in range(nb):
        y = _conv1x1(w, x_ref[b].astype(jnp.float32))     # (Cout, TM)
        o_ref[b] = jnp.maximum(y * scale + shift, 0.0).astype(o_ref.dtype)
    # NOTE: the ragged last spatial block computes on out-of-bounds columns,
    # but Pallas never writes those columns back, so no masking is needed.


def conv_bn_relu(x_nchw, weight, bias, gamma, beta):
    """x_nchw: (N, Cin, H, W); weight: (Cout, Cin, 1, 1); others: (Cout,)."""
    del bias  # exactly cancelled by training-mode BatchNorm (see header).
    N, Cin, H, W = x_nchw.shape
    Cout = weight.shape[0]
    HW = H * W
    M = N * HW

    # NCHW stays NCHW; no pad, no dtype change at the HBM boundary.
    x3d = x_nchw.reshape(N, Cin, HW)
    w2d = weight.reshape(Cout, Cin).astype(jnp.float32)
    out_dtype = x_nchw.dtype

    in_itemsize = x3d.dtype.itemsize
    out_itemsize = jnp.dtype(out_dtype).itemsize
    vmem_limit = _vmem_limit_bytes()

    # ---- pass 1: sum(x) and Gram(x) ----------------------------------------
    NB1, TM1 = _choose_blocking(N, HW, Cin * in_itemsize, vmem_limit)
    nblk1 = N // NB1
    num_m1 = pl.cdiv(HW, TM1)
    # Extra 'parallel' spatial-chunk axis so v7x's second TC has work when the
    # batch axis is tiny; chunks hold partial accumulators summed in the fold.
    if nblk1 >= 2 or num_m1 < 2 or (num_m1 % 2) != 0:
        MC = 1
    else:
        MC = 2
    m_per = num_m1 // MC

    stats = functools.partial(_stats_kernel, hw=HW, m_per=m_per)
    sumx_b, gram_b = pl.pallas_call(
        stats,
        out_shape=(jax.ShapeDtypeStruct((MC, nblk1, Cin, 1), jnp.float32),
                   jax.ShapeDtypeStruct((MC, nblk1, Cin, Cin), jnp.float32)),
        grid=(MC, nblk1, m_per),
        in_specs=[pl.BlockSpec((NB1, Cin, TM1),
                               lambda c, n, mm: (n, 0, c * m_per + mm))],
        out_specs=(pl.BlockSpec((None, None, Cin, 1),
                                lambda c, n, mm: (c, n, 0, 0)),
                   pl.BlockSpec((None, None, Cin, Cin),
                                lambda c, n, mm: (c, n, 0, 0))),
        compiler_params=pltpu.CompilerParams(
            dimension_semantics=("parallel", "parallel", "arbitrary"),
            vmem_limit_bytes=vmem_limit),
        cost_estimate=pl.CostEstimate(
            flops=int(2 * M * Cin * Cin + M * Cin),
            transcendentals=0,
            bytes_accessed=int(in_itemsize * N * Cin * HW
                               + 4 * MC * nblk1 * Cin * (Cin + 1))),
    )(x3d)

    # ---- fold BN constants (tiny (Cout,) work, plain JAX) -------------------
    sum_x = jnp.sum(sumx_b, axis=(0, 1))[:, 0]            # (Cin,)
    gram = jnp.sum(gram_b, axis=(0, 1))                   # (Cin, Cin)
    mean = (w2d @ sum_x) / M                              # (Cout,)
    ey2 = jnp.einsum('oc,cd,od->o', w2d, gram, w2d) / M   # diag(W G W^T)/M
    # NOTE: E[y^2]-mean^2 in f32 can cancel for very large-mean activations;
    # the guard below keeps var >= 0 (matches the typical normalized regime).
    var = jnp.maximum(ey2 - mean * mean, 0.0)
    scale = gamma.astype(jnp.float32) * jax.lax.rsqrt(var + BN_EPS)
    shift = beta.astype(jnp.float32) - mean * scale
    scale2d = scale.reshape(Cout, 1)
    shift2d = shift.reshape(Cout, 1)

    # ---- pass 2: conv recompute + fused scale/shift + ReLU ------------------
    NB2, TM2 = _choose_blocking(
        N, HW, Cin * in_itemsize + Cout * out_itemsize, vmem_limit)
    nblk2 = N // NB2
    num_m2 = pl.cdiv(HW, TM2)

    out3d = pl.pallas_call(
        _norm_kernel,
        out_shape=jax.ShapeDtypeStruct((N, Cout, HW), out_dtype),
        grid=(nblk2, num_m2),
        in_specs=[
            pl.BlockSpec((Cout, Cin), lambda n, m: (0, 0)),
            pl.BlockSpec((Cout, 1), lambda n, m: (0, 0)),
            pl.BlockSpec((Cout, 1), lambda n, m: (0, 0)),
            pl.BlockSpec((NB2, Cin, TM2), lambda n, m: (n, 0, m)),
        ],
        out_specs=pl.BlockSpec((NB2, Cout, TM2), lambda n, m: (n, 0, m)),
        compiler_params=pltpu.CompilerParams(
            dimension_semantics=("parallel", "parallel"),
            vmem_limit_bytes=vmem_limit),
        cost_estimate=pl.CostEstimate(
            flops=int(2 * M * Cin * Cout + 3 * M * Cout),
            transcendentals=0,
            bytes_accessed=int(in_itemsize * N * Cin * HW
                               + out_itemsize * N * Cout * HW
                               + 4 * Cout * (Cin + 2))),
    )(w2d, scale2d, shift2d, x3d)

    # (N, Cout, HW) -> (N, Cout, H, W): already NCHW, no slicing needed.
    return out3d.reshape(N, Cout, H, W)


def reference(x_nchw, weight, bias, gamma, beta):
    """Pure-JAX reference with identical semantics (for a sanity check)."""
    N, Cin, H, W = x_nchw.shape
    Cout = weight.shape[0]
    x2d = jnp.transpose(x_nchw, (0, 2, 3, 1)).reshape(-1, Cin).astype(jnp.float32)
    y = x2d @ weight.reshape(Cout, Cin).T.astype(jnp.float32) + bias
    mean = jnp.mean(y, axis=0, keepdims=True)
    var = jnp.mean((y - mean) ** 2, axis=0, keepdims=True)
    y = (y - mean) / jnp.sqrt(var + BN_EPS) * gamma + beta
    y = jnp.maximum(y, 0.0)
    return y.reshape(N, H, W, Cout).transpose(0, 3, 1, 2).astype(x_nchw.dtype)


if __name__ == "__main__":
    key = jax.random.PRNGKey(0)
    k_x, k_w = jax.random.split(key)

    N, Cin, H, W = 2, 4, 16, 16
    Cout = 8

    x = jax.random.normal(k_x, (N, Cin, H, W), dtype=jnp.float32)

    # Deterministic parameter init matching the PyTorch module's init_weight():
    #  - conv weight: kaiming_normal_(a=1) -> std = sqrt(2/(1+1)) / sqrt(fan_in)
    fan_in = Cin * 1 * 1
    w_std = 1.0 / jnp.sqrt(jnp.float32(fan_in))
    weight = w_std * jax.random.normal(k_w, (Cout, Cin, 1, 1), dtype=jnp.float32)
    #  - conv bias: constant 0
    bias = jnp.zeros((Cout,), dtype=jnp.float32)
    #  - BatchNorm2d defaults: weight=1, bias=0
    gamma = jnp.ones((Cout,), dtype=jnp.float32)
    beta = jnp.zeros((Cout,), dtype=jnp.float32)

    out = conv_bn_relu(x, weight, bias, gamma, beta)
    out = jax.block_until_ready(out)

    ref = reference(x, weight, bias, gamma, beta)
    assert out.shape == (N, Cout, H, W)
    assert jnp.allclose(out, ref, atol=1e-4, rtol=1e-4), float(
        jnp.max(jnp.abs(out - ref)))

    print("KERNEL_OK")
</pallas_src>

<mosaic_0001>
module attributes {stable_mosaic.version = 11 : i64} {
  func.func @_stats_kernel(%arg0: i32, %arg1: i32, %arg2: i32, %arg3: memref<2x4x256xf32, #tpu.memory_space<vmem>>, %arg4: memref<1x1x4x1xf32, #tpu.memory_space<vmem>>, %arg5: memref<1x1x4x4xf32, #tpu.memory_space<vmem>>) attributes {dimension_semantics = [#tpu.dimension_semantics<parallel>, #tpu.dimension_semantics<parallel>, #tpu.dimension_semantics<arbitrary>], iteration_bounds = array<i64: 1, 1, 1>, scalar_prefetch = 0 : i64, scratch_operands = 0 : i64, tpu.core_type = #tpu.core_type<tc>, window_params = [{transform_indices = @transform_0, window_bounds = array<i64: 2, 4, 256>}, {transform_indices = @transform_1, window_bounds = array<i64: 1, 1, 4, 1>}, {transform_indices = @transform_2, window_bounds = array<i64: 1, 1, 4, 4>}]} {
    %c0_i32 = arith.constant 0 : i32
    %0 = arith.cmpi eq, %arg2, %c0_i32 : i32
    %1 = arith.extui %0 : i1 to i32
    %c0_i32_0 = arith.constant 0 : i32
    %2 = arith.cmpi ne, %1, %c0_i32_0 : i32
    scf.if %2 {
      %cst_26 = arith.constant 0.000000e+00 : f32
      %31 = vector.broadcast %cst_26 : f32 to vector<4x1xf32>
      %c0_27 = arith.constant 0 : index
      %c0_28 = arith.constant 0 : index
      %c0_29 = arith.constant 0 : index
      %c0_30 = arith.constant 0 : index
      %32 = vector.load %arg4[%c0_27, %c0_28, %c0_29, %c0_30] : memref<1x1x4x1xf32, #tpu.memory_space<vmem>>, vector<1x1x4x1xf32>
      %33 = vector.shape_cast %32 : vector<1x1x4x1xf32> to vector<4x1xf32>
      %34 = vector.shape_cast %31 : vector<4x1xf32> to vector<1x1x4x1xf32>
      tpu.vector_store %arg4[%c0_27, %c0_28, %c0_29, %c0_30], %34 {strides = array<i32>} : memref<1x1x4x1xf32, #tpu.memory_space<vmem>>, vector<1x1x4x1xf32>,
      %cst_31 = arith.constant 0.000000e+00 : f32
      %35 = vector.broadcast %cst_31 : f32 to vector<4x4xf32>
      %c0_32 = arith.constant 0 : index
      %c0_33 = arith.constant 0 : index
      %c0_34 = arith.constant 0 : index
      %c0_35 = arith.constant 0 : index
      %36 = vector.load %arg5[%c0_32, %c0_33, %c0_34, %c0_35] : memref<1x1x4x4xf32, #tpu.memory_space<vmem>>, vector<1x1x4x4xf32>
      %37 = vector.shape_cast %36 : vector<1x1x4x4xf32> to vector<4x4xf32>
      %38 = vector.shape_cast %35 : vector<4x4xf32> to vector<1x1x4x4xf32>
      tpu.vector_store %arg5[%c0_32, %c0_33, %c0_34, %c0_35], %38 {strides = array<i32>} : memref<1x1x4x4xf32, #tpu.memory_space<vmem>>, vector<1x1x4x4xf32>,
    } else {
    }
    %cst = arith.constant 0.000000e+00 : f32
    %3 = vector.broadcast %cst : f32 to vector<4x1xf32>
    %cst_1 = arith.constant 0.000000e+00 : f32
    %4 = vector.broadcast %cst_1 : f32 to vector<4x4xf32>
    %c0 = arith.constant 0 : index
    %c0_2 = arith.constant 0 : index
    %c0_3 = arith.constant 0 : index
    %5 = vector.load %arg3[%c0, %c0_2, %c0_3] : memref<2x4x256xf32, #tpu.memory_space<vmem>>, vector<1x4x256xf32>
    %6 = vector.shape_cast %5 : vector<1x4x256xf32> to vector<4x256xf32>
    %cst_4 = arith.constant dense<0.000000e+00> : vector<4xf32>
    %7 = vector.multi_reduction <add>, %6, %cst_4 [1] : vector<4x256xf32> to vector<4xf32>
    %8 = vector.shape_cast %7 : vector<4xf32> to vector<4x1xf32>
    %9 = arith.addf %3, %8 : vector<4x1xf32>
    %cst_5 = arith.constant dense<0.000000e+00> : vector<4x4xf32>
    %10 = tpu.matmul %6, %6, %cst_5 {dimension_numbers = #tpu.dot_dimension_numbers<[1], [1], [0], [0], [0, 0, 1, 0], [], []>} : vector<4x256xf32>, vector<4x256xf32>, vector<4x4xf32> -> vector<4x4xf32>
    %11 = arith.addf %4, %10 : vector<4x4xf32>
    %c1 = arith.constant 1 : index
    %c0_6 = arith.constant 0 : index
    %c0_7 = arith.constant 0 : index
    %12 = vector.load %arg3[%c1, %c0_6, %c0_7] : memref<2x4x256xf32, #tpu.memory_space<vmem>>, vector<1x4x256xf32>
    %13 = vector.shape_cast %12 : vector<1x4x256xf32> to vector<4x256xf32>
    %cst_8 = arith.constant dense<0.000000e+00> : vector<4xf32>
    %14 = vector.multi_reduction <add>, %13, %cst_8 [1] : vector<4x256xf32> to vector<4xf32>
    %15 = vector.shape_cast %14 : vector<4xf32> to vector<4x1xf32>
    %16 = arith.addf %9, %15 : vector<4x1xf32>
    %cst_9 = arith.constant dense<0.000000e+00> : vector<4x4xf32>
    %17 = tpu.matmul %13, %13, %cst_9 {dimension_numbers = #tpu.dot_dimension_numbers<[1], [1], [0], [0], [0, 0, 1, 0], [], []>} : vector<4x256xf32>, vector<4x256xf32>, vector<4x4xf32> -> vector<4x4xf32>
    %18 = arith.addf %11, %17 : vector<4x4xf32>
    %c0_10 = arith.constant 0 : index
    %c0_11 = arith.constant 0 : index
    %c0_12 = arith.constant 0 : index
    %c0_13 = arith.constant 0 : index
    %19 = vector.load %arg4[%c0_10, %c0_11, %c0_12, %c0_13] : memref<1x1x4x1xf32, #tpu.memory_space<vmem>>, vector<1x1x4x1xf32>
    %20 = vector.shape_cast %19 : vector<1x1x4x1xf32> to vector<4x1xf32>
    %21 = arith.addf %20, %16 : vector<4x1xf32>
    %c0_14 = arith.constant 0 : index
    %c0_15 = arith.constant 0 : index
    %c0_16 = arith.constant 0 : index
    %c0_17 = arith.constant 0 : index
    %22 = vector.load %arg4[%c0_14, %c0_15, %c0_16, %c0_17] : memref<1x1x4x1xf32, #tpu.memory_space<vmem>>, vector<1x1x4x1xf32>
    %23 = vector.shape_cast %22 : vector<1x1x4x1xf32> to vector<4x1xf32>
    %24 = vector.shape_cast %21 : vector<4x1xf32> to vector<1x1x4x1xf32>
    tpu.vector_store %arg4[%c0_14, %c0_15, %c0_16, %c0_17], %24 {strides = array<i32>} : memref<1x1x4x1xf32, #tpu.memory_space<vmem>>, vector<1x1x4x1xf32>,
    %c0_18 = arith.constant 0 : index
    %c0_19 = arith.constant 0 : index
    %c0_20 = arith.constant 0 : index
    %c0_21 = arith.constant 0 : index
    %25 = vector.load %arg5[%c0_18, %c0_19, %c0_20, %c0_21] : memref<1x1x4x4xf32, #tpu.memory_space<vmem>>, vector<1x1x4x4xf32>
    %26 = vector.shape_cast %25 : vector<1x1x4x4xf32> to vector<4x4xf32>
    %27 = arith.addf %26, %18 : vector<4x4xf32>
    %c0_22 = arith.constant 0 : index
    %c0_23 = arith.constant 0 : index
    %c0_24 = arith.constant 0 : index
    %c0_25 = arith.constant 0 : index
    %28 = vector.load %arg5[%c0_22, %c0_23, %c0_24, %c0_25] : memref<1x1x4x4xf32, #tpu.memory_space<vmem>>, vector<1x1x4x4xf32>
    %29 = vector.shape_cast %28 : vector<1x1x4x4xf32> to vector<4x4xf32>
    %30 = vector.shape_cast %27 : vector<4x4xf32> to vector<1x1x4x4xf32>
    tpu.vector_store %arg5[%c0_22, %c0_23, %c0_24, %c0_25], %30 {strides = array<i32>} : memref<1x1x4x4xf32, #tpu.memory_space<vmem>>, vector<1x1x4x4xf32>,
    return
  }
  func.func @transform_0(%arg0: i32, %arg1: i32, %arg2: i32) -> (i32, i32, i32) {
    %c1_i32 = arith.constant 1 : i32
    %0 = arith.muli %arg0, %c1_i32 : i32
    %1 = arith.addi %0, %arg2 : i32
    %c0_i32 = arith.constant 0 : i32
    %c0_i32_0 = arith.constant 0 : i32
    return %arg1, %c0_i32, %1 : i32, i32, i32
  }
  func.func @transform_1(%arg0: i32, %arg1: i32, %arg2: i32) -> (i32, i32, i32, i32) {
    %c0_i32 = arith.constant 0 : i32
    %c0_i32_0 = arith.constant 0 : i32
    %c0_i32_1 = arith.constant 0 : i32
    return %arg0, %arg1, %c0_i32, %c0_i32_0 : i32, i32, i32, i32
  }
  func.func @transform_2(%arg0: i32, %arg1: i32, %arg2: i32) -> (i32, i32, i32, i32) {
    %c0_i32 = arith.constant 0 : i32
    %c0_i32_0 = arith.constant 0 : i32
    %c0_i32_1 = arith.constant 0 : i32
    return %arg0, %arg1, %c0_i32, %c0_i32_0 : i32, i32, i32, i32
  }
}

</mosaic_0001>

<bundles_post_ra>
// kernel: tpu_custom_call.1
= control target key start
LH: loop header
LB: loop body
LE: loop exit
PB: predicated region body
PF: predicated region fallthrough
CT: control target
= control target key end

     0   :  { %8 = vsyncpa [#allocation3], 0  ;;  %s338_s0 = inlined_call_operand.hbm [shape: f32[2,4,256], index: 0, kind: input, shape index: {}]   ;;  %s339_s1 = inlined_call_operand.vmem [shape: f32[1,1,4,1], index: 1, kind: output, shape index: {0}]   ;;  %s340_s2 = inlined_call_operand.hbm [shape: f32[1,1,4,4], index: 2, kind: output, shape index: {1}]  }
   0x1   :  { %9 = vsyncpa [#allocation4], 0  ;;  %s283_s9 = smov [#allocation2]   ;;  %s235_s13 = scalar_lea.hbm %s338_s0, 256 }
   0x2   :  { %s19_s10 = sshll.u32 %s283_s9, 4  ;;  %p236_p0 = scmp.ne.s32.totalorder %s338_s0, %s235_s13  ;;  %s20_s10 = int_to_ptr.vmem [resolvable:$true] %s19_s10 }
   0x3   :  { %p239_p1 = scmp.lt.u32.totalorder %s235_s13, %s338_s0 }
   0x5   :  { %p241_p2 = pnand %p239_p1, %p236_p0 }
   0x7   :  { %244 = shalt.err (!%p241_p2)
}
   0x8   :  { %s245_s18 = scalar_lea.vmem %s20_s10, 256  ;;  %p250_p4 = scmp.lt.s32.totalorder %s20_s10, %s20_s10 }
   0x9   :  { %p246_p3 = scmp.ne.s32.totalorder %s20_s10, %s245_s18  ;;  %p251_p5 = scmp.lt.s32.totalorder %s245_s18, %s245_s18 }
   0xb   :  { %p252_p6 = por %p251_p5, %p250_p4 }
   0xd   :  { %p253_p7 = pnand %p252_p6, %p246_p3 }
   0xf   :  { %256 = shalt.err (!%p253_p7)
}
  0x10   :  { %s284_s19 = smov 128   ;;  %s285_s20 = smov 8  }
  0x11   :  { %25 = dma.hbm_to_vmem [thread:$0]  %s338_s0, 256, %s20_s10, [#allocation3], %s284_s19, %s284_s19, %s285_s20  }
  0x12   :  { %279 = dma.done.wait [#allocation3], 256  }
  0x13   :  { %280 = vsyncadd [#allocation3], 4294967040  ;;  %vm37_vm0 = vcmask 27648   ;;  %v286_v0 = vmov 0.0   ;;  %vm43_vm1 = vcmask 1043456   ;;  %v51_v1 = vld [vmem:[#allocation2 + $0x8] sm:$0xff] }
  0x14   :  { %38 = vst.msk [vmem:[#allocation5] sm:$0xf] %vm37_vm0, %v286_v0  ;;  %v39_v2 = vld [vmem:[#allocation2] sm:$0xff]  ;;  %v53_v3 = vcombine.high %v51_v1, %v51_v1  ;;  %v55_v7 = vsel %vm43_vm1, %v51_v1, 0.0  ;;  %vm35_vm2 = vcmask 3072   ;;  %s287_s28 = smov [#allocation5]  }
  0x15   :  { %v41_v4 = vcombine.high %v39_v2, %v39_v2  ;;  %v44_v5 = vsel %vm43_vm1, %v39_v2, 0.0  ;;  %36 = vst.msk [vmem:[%s339_s1] sm:$0xf] %vm35_vm2, %v286_v0  ;;  %s217_s29 = sshll.u32 %s287_s28, 4  ;;  %s218_s29 = int_to_ptr.vmem [resolvable:$true] %s217_s29 }
  0x16   :  { %61 = vmatprep.subr.mxu0 %v53_v3  ;;  %v56_v8 = vsel %vm43_vm1, %v53_v3, 0.0  ;;  %125 = vmatprep.mubr.f32.mxu0 %v53_v3  ;;  %s257_s30 = scalar_lea.vmem %s218_s29, 64  ;;  %p262_p9 = scmp.lt.s32.totalorder %s218_s29, %s218_s29 }
  0x17   :  { %131 = vmatprep.subr.mxu1 %v41_v4  ;;  %v45_v6 = vsel %vm43_vm1, %v41_v4, 0.0  ;;  %62 = vmatpush1.xpose.msra.mxu0 %v51_v1  ;;  %v57_v10 = vadd.f32 %v56_v8, %v55_v7  ;;  %p258_p8 = scmp.ne.s32.totalorder %s218_s29, %s257_s30  ;;  %p263_p10 = scmp.lt.s32.totalorder %s257_s30, %s257_s30 }
  0x18   :  { %132 = vmatpush1.xpose.msra.mxu1 %v39_v2  ;;  %v46_v9 = vadd.f32 %v45_v6, %v44_v5  ;;  %195 = vmatprep.mubr.f32.mxu1 %v41_v4 }
  0x19   :  { %p264_p11 = por %p263_p10, %p262_p9 }
  0x1a   :  { %47 = vadd.xlane.f32.xlu0 %v46_v9  ;;  %126 = vmatmul.mubr.f32.vlgmr.msra.gmra.mrb[0].mxu0 %v51_v1 }
  0x1b   :  { %196 = vmatmul.mubr.f32.vlgmr.msra.gmra.mrb[0].mxu1 %v39_v2  ;;  %v205_v18 = vld [vmem:[#allocation5] sm:$0xf]  ;;  %p265_p12 = pnand %p264_p11, %p258_p8 }
  0x1c   :  { %v201_v13 = vld [vmem:[%s339_s1] sm:$0xf] }
  0x1e   :  { %58 = vadd.xlane.f32.xlu0 %v57_v10 }
  0xa7   :  { %v48_v11 = vpop.xlane.xlu0 %47 }
  0xab   :  { %v59_v12 = vpop.xlane.xlu0 %58 }
  0xac   :  { %v60_v14 = vadd.f32 %v59_v12, %v48_v11 }
  0xae   :  { %v202_v15 = vadd.f32 %v201_v13, %v60_v14 }
  0xb0   :  { %204 = vst.msk [vmem:[%s339_s1] sm:$0xf] %vm35_vm2, %v202_v15 }
  0xed   :  { %v127_v16 = vpop.f32.mrb[0].mxu0 }
  0xee   :  { %v197_v17 = vpop.f32.mrb[0].mxu1  ;;  %v129_v20 = vpop.f32.mrb[1].mxu0 }
  0xef   :  { %v198_v19 = vadd.f32 %v197_v17, %v127_v16  ;;  %v199_v21 = vpop.f32.mrb[1].mxu1 }
  0xf1   :  { %v206_v22 = vadd.f32 %v205_v18, %v198_v19 }
  0xf3   :  { %208 = vst.msk [vmem:[#allocation5] sm:$0xf] %vm37_vm0, %v206_v22 }
  0xf4   :  { %268 = shalt.err (!%p265_p12)
}
  0xf5   :  { %s269_s4 = scalar_lea.hbm %s340_s2, 64 }
  0xf6   :  { %p270_p13 = scmp.ne.s32.totalorder %s340_s2, %s269_s4  ;;  %p273_p0 = scmp.lt.u32.totalorder %s269_s4, %s340_s2 }
  0xf8   :  { %p275_p1 = pnand %p273_p0, %p270_p13 }
  0xfa   :  { %278 = shalt.err (!%p275_p1)
}
  0xfb   :  { %220 = dma.vmem_to_hbm [thread:$0]  %s218_s29, 64, %s340_s2, [#allocation4]  }
  0xfc   :  { %281 = dma.done.wait [#allocation4], 64  }
  0xfd   :  { %282 = vsyncadd [#allocation4], 4294967232 }
  0xfe   :  { %226 = vsyncpa [#allocation3], 1 }
  0xff   :  { %227 = vsyncpa [#allocation4], 1 }

</bundles_post_ra>
